<compile_context>
chip_gen: v6e
topology: v6e:2x2x1
jax: 0.10.0
libtpu: 0.0.40
codegen_flags: <defaults>
</compile_context>

<pallas_src>
import functools

import jax
import jax.numpy as jnp
from jax.experimental import pallas as pl
from jax.experimental.pallas import tpu as pltpu


def mlp_kernel(x_ref, w1t_ref, b1_ref, w2t_ref, b2_ref, o_ref):
    # One batch tile per grid step:  o = relu(x @ W1^T + b1) @ W2^T + b2
    x = x_ref[...].astype(w1t_ref.dtype)             # match MXU input dtype
    h = jnp.dot(x, w1t_ref[...], preferred_element_type=jnp.float32)
    h = jnp.maximum(h + b1_ref[...], 0.0)            # bias-add + ReLU in f32 (VPU)
    h = h.astype(w2t_ref.dtype)
    out = jnp.dot(h, w2t_ref[...], preferred_element_type=jnp.float32)
    out = out + b2_ref[...]
    # out_size=1 -> lane-sparse (masked) store; cheaper than padding the
    # output to 128 lanes (which would 128x the output HBM writeback).
    o_ref[...] = out.astype(o_ref.dtype)


def prepare_params(w1, b1, w2, b2, compute_dtype=jnp.float32):
    """One-time parameter packing (PyTorch nn.Linear layout -> kernel layout).

    w1: (hidden, in), b1: (hidden,), w2: (out, hidden), b2: (out,)
    Returns (w1_t, b1_2d, w2_t, b2_2d): weights transposed to (in, hidden) /
    (hidden, out), optionally cast to a narrower MXU dtype; biases stay f32.
    """
    return (
        jnp.asarray(w1.T, dtype=compute_dtype),              # (in, hidden)
        jnp.asarray(b1, dtype=jnp.float32).reshape(1, -1),   # (1, hidden)
        jnp.asarray(w2.T, dtype=compute_dtype),              # (hidden, out)
        jnp.asarray(b2, dtype=jnp.float32).reshape(1, -1),   # (1, out)
    )


def neurel_net_forward(x, params, *, tile_b=512):
    """x: (B, in_size) float32; params from prepare_params."""
    w1_t, b1_2d, w2_t, b2_2d = params
    B, in_size = x.shape
    hidden = w1_t.shape[1]
    out_size = w2_t.shape[1]

    # Batch tile: full batch if it fits in a single tile (block == full array
    # is always legal); otherwise a sublane-aligned tile, padding B up.
    if B <= tile_b:
        tb = B
        x_p = x
    else:
        assert tile_b % 8 == 0, "tile_b must be a multiple of 8 (sublane)"
        tb = tile_b
        pad = (-B) % tb
        x_p = jnp.pad(x, ((0, pad), (0, 0))) if pad else x
    bp = x_p.shape[0]
    grid = (bp // tb,)

    # VMEM budget: resident weights + double-buffered activation tiles.
    f32 = 4
    weight_bytes = ((w1_t.size + w2_t.size) * w1_t.dtype.itemsize
                    + (b1_2d.size + b2_2d.size) * f32)
    act_bytes = (2 * tb * in_size + tb * hidden + 2 * tb * out_size) * f32
    vmem_limit = int(min(max(2 * (weight_bytes + act_bytes) + (1 << 20), 32 << 20),
                         64 << 20))

    cost = pl.CostEstimate(
        flops=2 * bp * hidden * (in_size + out_size),
        transcendentals=0,
        bytes_accessed=weight_bytes + f32 * bp * (in_size + out_size),
    )

    # Weights/biases: full-array blocks, constant index_map -> VMEM resident.
    resident = lambda shape: pl.BlockSpec(shape, lambda i: (0,) * len(shape))

    out = pl.pallas_call(
        mlp_kernel,
        out_shape=jax.ShapeDtypeStruct((bp, out_size), x.dtype),
        grid=grid,
        in_specs=[
            pl.BlockSpec((tb, in_size), lambda i: (i, 0)),   # batch-tiled activations
            resident(w1_t.shape),
            resident(b1_2d.shape),
            resident(w2_t.shape),
            resident(b2_2d.shape),
        ],
        out_specs=pl.BlockSpec((tb, out_size), lambda i: (i, 0)),
        compiler_params=pltpu.CompilerParams(
            dimension_semantics=("parallel",),   # megacore: split batch tiles
            vmem_limit_bytes=vmem_limit,
        ),
        cost_estimate=cost,
    )(x_p, w1_t, b1_2d, w2_t, b2_2d)

    return out[:B] if bp != B else out


def neurel_net_ref(x, w1, b1, w2, b2):
    h = jnp.maximum(x @ w1.T + b1, 0.0)
    return h @ w2.T + b2


if __name__ == "__main__":
    # OR-gate style module: in_size=2, hidden_size=32, out_size=1.
    # Batch 64 with tile_b=32 so the batch-tiled grid / pipelining is exercised.
    in_size, hidden_size, out_size = 2, 32, 1
    batch = 64

    key = jax.random.PRNGKey(0)
    k_x, k_w1, k_b1, k_w2, k_b2 = jax.random.split(key, 5)

    x = jax.random.normal(k_x, (batch, in_size), dtype=jnp.float32)
    w1 = jax.random.normal(k_w1, (hidden_size, in_size), dtype=jnp.float32) * 0.1
    b1 = jax.random.normal(k_b1, (hidden_size,), dtype=jnp.float32) * 0.1
    w2 = jax.random.normal(k_w2, (out_size, hidden_size), dtype=jnp.float32) * 0.1
    b2 = jax.random.normal(k_b2, (out_size,), dtype=jnp.float32) * 0.1

    params = prepare_params(w1, b1, w2, b2)   # one-time transpose/reshape/cast

    # jit the wrapper so batch pad/slice fuse with the kernel dispatch.
    fwd = jax.jit(functools.partial(neurel_net_forward, tile_b=32))
    out = fwd(x, params)
    jax.block_until_ready(out)

    ref = neurel_net_ref(x, w1, b1, w2, b2)
    assert out.shape == (batch, out_size)
    assert jnp.allclose(out, ref, atol=1e-5, rtol=1e-5)

    print("KERNEL_OK")
</pallas_src>

<mosaic_0001>
module attributes {stable_mosaic.version = 11 : i64} {
  func.func @mlp_kernel(%arg0: i32, %arg1: memref<32x2xf32, #tpu.memory_space<vmem>>, %arg2: memref<2x32xf32, #tpu.memory_space<vmem>>, %arg3: memref<1x32xf32, #tpu.memory_space<vmem>>, %arg4: memref<32x1xf32, #tpu.memory_space<vmem>>, %arg5: memref<1x1xf32, #tpu.memory_space<vmem>>, %arg6: memref<32x1xf32, #tpu.memory_space<vmem>>) attributes {dimension_semantics = [#tpu.dimension_semantics<parallel>], iteration_bounds = array<i64: 2>, scalar_prefetch = 0 : i64, scratch_operands = 0 : i64, tpu.core_type = #tpu.core_type<tc>, window_params = [{transform_indices = @transform_0, window_bounds = array<i64: 32, 2>}, {pipeline_mode = #tpu.pipeline_mode<synchronous>, transform_indices = @transform_1, window_bounds = array<i64: 2, 32>}, {pipeline_mode = #tpu.pipeline_mode<synchronous>, transform_indices = @transform_2, window_bounds = array<i64: 1, 32>}, {pipeline_mode = #tpu.pipeline_mode<synchronous>, transform_indices = @transform_3, window_bounds = array<i64: 32, 1>}, {pipeline_mode = #tpu.pipeline_mode<synchronous>, transform_indices = @transform_4, window_bounds = array<i64: 1, 1>}, {transform_indices = @transform_5, window_bounds = array<i64: 32, 1>}]} {
    %c0 = arith.constant 0 : index
    %c0_0 = arith.constant 0 : index
    %0 = vector.load %arg1[%c0, %c0_0] : memref<32x2xf32, #tpu.memory_space<vmem>>, vector<32x2xf32>
    %c0_1 = arith.constant 0 : index
    %c0_2 = arith.constant 0 : index
    %1 = vector.load %arg2[%c0_1, %c0_2] : memref<2x32xf32, #tpu.memory_space<vmem>>, vector<2x32xf32>
    %cst = arith.constant dense<0.000000e+00> : vector<32x32xf32>
    %2 = tpu.matmul %0, %1, %cst {dimension_numbers = #tpu.dot_dimension_numbers<[1], [0], [0], [1], [0, 0, 1, 1], [], []>} : vector<32x2xf32>, vector<2x32xf32>, vector<32x32xf32> -> vector<32x32xf32>
    %c0_3 = arith.constant 0 : index
    %c0_4 = arith.constant 0 : index
    %3 = vector.load %arg3[%c0_3, %c0_4] : memref<1x32xf32, #tpu.memory_space<vmem>>, vector<1x32xf32>
    %4 = vector.broadcast %3 : vector<1x32xf32> to vector<32x32xf32>
    %5 = arith.addf %2, %4 : vector<32x32xf32>
    %cst_5 = arith.constant 0.000000e+00 : f32
    %6 = vector.broadcast %cst_5 : f32 to vector<32x32xf32>
    %7 = arith.maximumf %5, %6 : vector<32x32xf32>
    %c0_6 = arith.constant 0 : index
    %c0_7 = arith.constant 0 : index
    %8 = vector.load %arg4[%c0_6, %c0_7] : memref<32x1xf32, #tpu.memory_space<vmem>>, vector<32x1xf32>
    %cst_8 = arith.constant dense<0.000000e+00> : vector<32x1xf32>
    %9 = tpu.matmul %7, %8, %cst_8 {dimension_numbers = #tpu.dot_dimension_numbers<[1], [0], [0], [1], [0, 0, 1, 1], [], []>} : vector<32x32xf32>, vector<32x1xf32>, vector<32x1xf32> -> vector<32x1xf32>
    %c0_9 = arith.constant 0 : index
    %c0_10 = arith.constant 0 : index
    %10 = vector.load %arg5[%c0_9, %c0_10] : memref<1x1xf32, #tpu.memory_space<vmem>>, vector<1x1xf32>
    %11 = vector.broadcast %10 : vector<1x1xf32> to vector<32x1xf32>
    %12 = arith.addf %9, %11 : vector<32x1xf32>
    %c0_11 = arith.constant 0 : index
    %c0_12 = arith.constant 0 : index
    %13 = vector.load %arg6[%c0_11, %c0_12] : memref<32x1xf32, #tpu.memory_space<vmem>>, vector<32x1xf32>
    tpu.vector_store %arg6[%c0_11, %c0_12], %12 {strides = array<i32>} : memref<32x1xf32, #tpu.memory_space<vmem>>, vector<32x1xf32>,
    return
  }
  func.func @transform_0(%arg0: i32) -> (i32, i32) {
    %c0_i32 = arith.constant 0 : i32
    %c0_i32_0 = arith.constant 0 : i32
    return %arg0, %c0_i32 : i32, i32
  }
  func.func @transform_1(%arg0: i32) -> (i32, i32) {
    %c0_i32 = arith.constant 0 : i32
    %c0_i32_0 = arith.constant 0 : i32
    %c0_i32_1 = arith.constant 0 : i32
    return %c0_i32, %c0_i32_0 : i32, i32
  }
  func.func @transform_2(%arg0: i32) -> (i32, i32) {
    %c0_i32 = arith.constant 0 : i32
    %c0_i32_0 = arith.constant 0 : i32
    %c0_i32_1 = arith.constant 0 : i32
    return %c0_i32, %c0_i32_0 : i32, i32
  }
  func.func @transform_3(%arg0: i32) -> (i32, i32) {
    %c0_i32 = arith.constant 0 : i32
    %c0_i32_0 = arith.constant 0 : i32
    %c0_i32_1 = arith.constant 0 : i32
    return %c0_i32, %c0_i32_0 : i32, i32
  }
  func.func @transform_4(%arg0: i32) -> (i32, i32) {
    %c0_i32 = arith.constant 0 : i32
    %c0_i32_0 = arith.constant 0 : i32
    %c0_i32_1 = arith.constant 0 : i32
    return %c0_i32, %c0_i32_0 : i32, i32
  }
  func.func @transform_5(%arg0: i32) -> (i32, i32) {
    %c0_i32 = arith.constant 0 : i32
    %c0_i32_0 = arith.constant 0 : i32
    return %arg0, %c0_i32 : i32, i32
  }
}

</mosaic_0001>

<bundles_post_ra>
// kernel: neurel_net_forward.1
= control target key start
LH: loop header
LB: loop body
LE: loop exit
PB: predicated region body
PF: predicated region fallthrough
CT: control target
= control target key end

     0   :  { %s632_s20 = smov 0   ;;  %s674_s0 = inlined_call_operand.vmem [shape: f32[64,2], index: 0, kind: input, shape index: {}]   ;;  %s675_s1 = inlined_call_operand.vmem [shape: f32[2,32], index: 1, kind: input, shape index: {}]   ;;  %s676_s2 = inlined_call_operand.vmem [shape: f32[1,32], index: 2, kind: input, shape index: {}]   ;;  %s677_s3 = inlined_call_operand.vmem [shape: f32[32,1], index: 3, kind: input, shape index: {}]   ;;  %s678_s4 = inlined_call_operand.<no memory space> [shape: f32[1,1], index: 4, kind: input, shape index: {}]   ;;  %s679_s5 = inlined_call_operand.vmem [shape: f32[64,1], index: 5, kind: output, shape index: {}]  }
   0x1   :  { %v10_v0 = vstv %s678_s4 }
   0x2   :  { %11 = vst [vmem:[#allocation2] sm:$0x1] %v10_v0 }
   0x3 LB: > { %s518_s21 = sadd.s32 4294967295, %s597_s20   ;;  %p522_p0 = scmp.ge.s32.totalorder %s597_s20, 1  ;;  %s597_s20 = sphi %s632_s20, %s17_s20  }
   0x4   : > { %p190_p1 = scmp.lt.s32.totalorder %s597_s20, 3 }
   0x6   : > { %p191_p2 = pnand %p522_p0, %p190_p1 }
   0x7   : > { %s523_s4 = sshll.u32 (!%p191_p2), %s518_s21, 2 }
   0x8   : > { %194 = sbr.rel (%p191_p2) target bundleno = 420 (0x1a4), region = 40  ;;  %p219_p3 = scmp.lt.s32.totalorder (!%p191_p2), %s523_s4, 7 }
   0xd   : > { %v234_v1 = vld [vmem:[%s675_s1] sm:$0x3]  ;;  %vm255_vm0 = vcmask 1041408   ;;  %s681_s4 = smov (!%p219_p3, %s523_s4), 7  ;;  %vm242_vm1 = vcmask 15360   ;;  %v351_v6 = vld [vmem:[%s677_s3 + $0x18] sm:$0xff] }
   0xe   : > { %553 = vmatprep.subr.msk.mxu0 %vm255_vm0, %v234_v1  ;;  %s524_s24 = sshll.u32 %s681_s4, 3  ;;  %575 = vmatprep.subr.mxu1 %v351_v6  ;;  %v350_v7 = vld [vmem:[%s677_s3 + $0x10] sm:$0xff]  ;;  %v349_v8 = vld [vmem:[%s677_s3 + $0x8] sm:$0xff]  ;;  %v348_v9 = vld [vmem:[%s677_s3] sm:$0xff]  ;;  %vm359_vm2 = vcmask 261120   ;;  %vm457_vm3 = vcmask 7168  }
   0xf   : > { %554 = vmatpush3.msk.msra.mxu0 %vm255_vm0, %v234_v1  ;;  %s222_s27 = scalar_lea.vmem %s674_s0, %s524_s24  ;;  %579 = vmatpush3.msra.mxu1 %v351_v6  ;;  %v527_v10 = vld [vmem:[%s676_s2] ss:$0 sm:$0xff]  ;;  %s228_s15 = scalar_lea.vmem %s679_s5, %s524_s24 }
  0x10   : > { %v230_v2 = vld [vmem:[%s222_s27] sm:$0xff]  ;;  %v231_v3 = vld [vmem:[%s222_s27 + $0x8] sm:$0xff]  ;;  %v232_v4 = vld [vmem:[%s222_s27 + $0x10] sm:$0xff]  ;;  %561 = vmatprep.subr.mxu0 %v351_v6  ;;  %576 = vmatprep.subr.mxu1 %v350_v7 }
  0x11   : > { %555 = vmatprep.mubr.msk.f32.mxu0 %vm242_vm1, %v230_v2  ;;  %v233_v5 = vld [vmem:[%s222_s27 + $0x18] sm:$0xff]  ;;  %580 = vmatpush3.msra.mxu1 %v350_v7  ;;  %v533_v24 = vld [vmem:[#allocation2] ss:$0 sm:$0xff] }
  0x12   : > { %556 = vmatmul.mubr.msk.f32.vlgmr.msra.gmra.mxu0 %vm242_vm1, %v231_v3  ;;  %577 = vmatprep.subr.mxu1 %v349_v8 }
  0x13   : > { %558 = vmatprep.mubr.msk.f32.mxu0 %vm242_vm1, %v232_v4  ;;  %562 = vmatpush3.msra.mxu0 %v351_v6 }
  0x14   : > { %563 = vmatprep.subr.mxu0 %v350_v7  ;;  %581 = vmatpush3.msra.mxu1 %v349_v8 }
  0x15   : > { %564 = vmatpush3.msra.mxu0 %v350_v7  ;;  %578 = vmatprep.subr.mxu1 %v348_v9 }
  0x16   : > { %559 = vmatmul.mubr.msk.f32.gmra.mxu0 %vm242_vm1, %v233_v5  ;;  %565 = vmatprep.subr.mxu0 %v349_v8 }
  0x17   : > { %566 = vmatpush3.msra.mxu0 %v349_v8  ;;  %582 = vmatpush3.msra.mxu1 %v348_v9 }
  0x18   : > { %567 = vmatprep.subr.mxu0 %v348_v9 }
  0x19   : > { %568 = vmatpush3.msra.mxu0 %v348_v9 }
  0xd2   : > { %v557_v11 = vpop.f32.mrf.mxu0 }
  0xd3   : > { %v331_v12 = vadd.f32 %v557_v11, %v527_v10 }
  0xd4   : > { %v325_v13 = vpop.f32.mrf.mxu0 }
  0xd5   : > { %v326_v14 = vadd.f32 %v527_v10, %v325_v13  ;;  %v345_v17 = vmax.f32 %v331_v12, 0.0 }
  0xd6   : > { %v560_v15 = vpop.f32.mrf.mxu0 }
  0xd7   : > { %v344_v16 = vmax.f32 %v326_v14, 0.0  ;;  %v341_v18 = vadd.f32 %v560_v15, %v527_v10 }
  0xd8   : > { %v335_v19 = vpop.f32.mrf.mxu0 }
  0xd9   : > { %v336_v20 = vadd.f32 %v527_v10, %v335_v19  ;;  %569 = vmatprep.mubr.msk.f32.mxu0 %vm359_vm2, %v344_v16  ;;  %v347_v22 = vmax.f32 %v341_v18, 0.0 }
  0xda   : > { %570 = vmatmul.mubr.msk.f32.vlgmr.msra.gmra.mxu0 %vm359_vm2, %v345_v17 }
  0xdb   : > { %v346_v21 = vmax.f32 %v336_v20, 0.0 }
  0xdd   : > { %572 = vmatprep.mubr.msk.f32.mxu1 %vm359_vm2, %v346_v21 }
  0xde   : > { %573 = vmatmul.mubr.msk.f32.vlgmr.msra.gmra.mxu1 %vm359_vm2, %v347_v22 }
 0x19a   : > { %v571_v23 = vpop.f32.mrf.mxu0 }
 0x19b   : > { %v444_v27 = vadd.f32 %v571_v23, %v533_v24 }
 0x19c   : > { %v438_v25 = vpop.f32.mrf.mxu0 }
 0x19d   : > { %v439_v26 = vadd.f32 %v533_v24, %v438_v25  ;;  %459 = vst.msk [vmem:[%s228_s15 + $0x8] sm:$0xff] %vm457_vm3, %v444_v27 }
 0x19e   : > { %v574_v28 = vpop.f32.mrf.mxu1 }
 0x19f   : > { %458 = vst.msk [vmem:[%s228_s15] sm:$0xff] %vm457_vm3, %v439_v26  ;;  %v454_v31 = vadd.f32 %v574_v28, %v533_v24 }
 0x1a0   : > { %v448_v29 = vpop.f32.mrf.mxu1 }
 0x1a1   : > { %v449_v30 = vadd.f32 %v533_v24, %v448_v29  ;;  %461 = vst.msk [vmem:[%s228_s15 + $0x18] sm:$0xff] %vm457_vm3, %v454_v31 }
 0x1a3   : > { %460 = vst.msk [vmem:[%s228_s15 + $0x10] sm:$0xff] %vm457_vm3, %v449_v30 }
 0x1a4 PF: > { %s17_s20 = sadd.s32 1, %s597_s20  }
 0x1a5   : > { %p14_p4 = scmp.ge.s32.totalorder %s17_s20, 4  }
 0x1a7   :  { %16 = sbr.rel (!%p14_p4) target bundleno = 3 (0x3), region = 70 }

</bundles_post_ra>
